<compile_context>
chip_gen: v5e
topology: v5e:2x2
jax: 0.10.0
libtpu: 0.0.40
codegen_flags: <defaults>
</compile_context>

<pallas_src>
import functools

import jax
import jax.numpy as jnp
from jax.experimental import pallas as pl
from jax.experimental.pallas import tpu as pltpu

EPS = 1e-5


# ---------------------------------------------------------------------------
# Trace-time helpers (no Pallas)
# ---------------------------------------------------------------------------
def _fold_bn(p):
    """Inference-mode BatchNorm -> per-channel (scale, shift)."""
    scale = p["gamma"] / jnp.sqrt(p["var"] + EPS)
    shift = p["beta"] - p["mean"] * scale
    return scale, shift


def _banded_conv3x3(w, scale, W, Wo, stride, dtype):
    """(3,3,Cin,Cout) HWIO -> (3*W*Cin, Wo*Cout) banded matrix.

    Row index = (ky, wi, ci) matching the in-kernel tap concat order
    [dy=-1 | dy=0 | dy=+1]; the pad=1 column halo and the column stride are
    folded into the band; the BN scale is folded into the output columns.
    """
    wi = jnp.arange(W)
    wo = jnp.arange(Wo)
    kx = jnp.arange(3)
    sel = (wi[None, :, None]
           == stride * wo[None, None, :] + kx[:, None, None] - 1)
    sel = sel.astype(w.dtype)                                   # (3, W, Wo)
    bw = jnp.einsum("yxio,xwv->ywivo", w, sel)                  # (3,W,Cin,Wo,Cout)
    Cin, Cout = w.shape[2], w.shape[3]
    bw = bw.reshape(3 * W * Cin, Wo * Cout)
    bw = bw * jnp.tile(scale, Wo)[None, :]                      # fold BN scale
    return bw.astype(dtype)


def _banded_conv1x1(wsc, scale, W, Wo, stride, dtype):
    """(Cin,Cout) -> (W*Cin, Wo*Cout) strided block-banded 1x1 projection."""
    Cin, Cout = wsc.shape
    sel = (jnp.arange(W)[:, None] == stride * jnp.arange(Wo)[None, :])
    sel = sel.astype(wsc.dtype)                                 # (W, Wo)
    bw = jnp.einsum("io,wv->wivo", wsc, sel).reshape(W * Cin, Wo * Cout)
    bw = bw * jnp.tile(scale, Wo)[None, :]
    return bw.astype(dtype)


def _tile_shift(shift, Wo):
    """(C,) BN shift -> (1, Wo*C) in the lane-packed (w, c) layout, f32."""
    return jnp.tile(shift.astype(jnp.float32), Wo)[None, :]


def _pick_batch_block(N, Ho, target_rows=256):
    """Images per grid step: grow MXU M toward target_rows, but keep the
    parallel grid axis >= 2 when N allows (v7x has 2 TensorCores)."""
    if N <= 1:
        return 1
    nb_cap = max(1, min(N // 2, target_rows // max(Ho, 1)))
    for nb in range(nb_cap, 0, -1):
        if N % nb == 0:
            return nb
    return 1


# ---------------------------------------------------------------------------
# Fused BasicBlock kernel (one grid step = Nb images, whole block)
# ---------------------------------------------------------------------------
def _basic_block_kernel(x_ref, bw1_ref, sh1_ref, bw2_ref, sh2_ref, *rest,
                        stride, H, Ho, shortcut):
    """x_ref    : (Nb, H, W*Cin)      lane-packed input (bf16)
       bw1_ref  : (3*W*Cin, Wo*C1)    banded conv1 weights, BN1 scale folded
       sh1_ref  : (1, Wo*C1)          BN1 shift (f32)
       bw2_ref  : (3*Wo*C1, Wo*C1)    banded conv2 weights, BN2 scale folded
       sh2_ref  : (1, Wo*C1)          BN2 shift (f32)
       proj extras: bwsc_ref (W*Cin, Wo*C1), shsc_ref (1, Wo*C1)
       out_ref  : (Nb, Ho, Wo*C1)     f32 output
    """
    if shortcut == "proj":
        bwsc_ref, shsc_ref, out_ref = rest
    else:
        (out_ref,) = rest

    Nb, _, Lin = x_ref.shape
    L1 = sh1_ref.shape[1]
    Lout = out_ref.shape[2]
    cdt = x_ref.dtype                       # compute (MXU operand) dtype

    # ---- conv1 + bn1 + relu: one (Nb*Ho, 3*Lin) x (3*Lin, L1) MXU dot ------
    def ref_tap(dy):
        # Rows stride*ho + dy of x for every output row ho; out-of-range
        # (pad=1) rows are zeroed instead of range-slicing an accumulator.
        ho_lo = 0
        while stride * ho_lo + dy < 0:
            ho_lo += 1
        ho_hi = Ho
        while stride * (ho_hi - 1) + dy > H - 1:
            ho_hi -= 1
        n = ho_hi - ho_lo
        r0 = stride * ho_lo + dy
        if stride == 1:
            rows = x_ref[:, r0:r0 + n, :]
        else:
            rows = jnp.stack(
                [x_ref[b, pl.ds(r0, n, stride), :] for b in range(Nb)], axis=0)
        parts = []
        if ho_lo:
            parts.append(jnp.zeros((Nb, ho_lo, Lin), cdt))
        parts.append(rows)
        if Ho - ho_hi:
            parts.append(jnp.zeros((Nb, Ho - ho_hi, Lin), cdt))
        return jnp.concatenate(parts, axis=1) if len(parts) > 1 else rows

    x3 = jnp.concatenate([ref_tap(-1), ref_tap(0), ref_tap(1)],
                         axis=-1).reshape(Nb * Ho, 3 * Lin)
    y1 = jnp.dot(x3, bw1_ref[...], preferred_element_type=jnp.float32)
    y1 = jnp.maximum(y1 + sh1_ref[...], 0.0)          # BN1 shift + ReLU
    y1 = y1.astype(cdt).reshape(Nb, Ho, L1)           # stays on-chip

    # ---- conv2 + bn2 (stride 1, pad 1): again a single MXU dot -------------
    zrow = jnp.zeros((Nb, 1, L1), cdt)
    up = jnp.concatenate([zrow, y1[:, :-1, :]], axis=1)   # row ho-1 (dy=-1)
    dn = jnp.concatenate([y1[:, 1:, :], zrow], axis=1)    # row ho+1 (dy=+1)
    y3 = jnp.concatenate([up, y1, dn], axis=-1).reshape(Nb * Ho, 3 * L1)
    y2 = jnp.dot(y3, bw2_ref[...], preferred_element_type=jnp.float32)
    y2 = y2 + sh2_ref[...]                                # BN2 shift

    # ---- fused shortcut -----------------------------------------------------
    if shortcut == "proj":
        if stride == 1:
            xs = x_ref[...]
        else:
            xs = jnp.stack(
                [x_ref[b, pl.ds(0, Ho, stride), :] for b in range(Nb)], axis=0)
        sc = jnp.dot(xs.reshape(Nb * Ho, Lin), bwsc_ref[...],
                     preferred_element_type=jnp.float32)
        y2 = y2 + (sc + shsc_ref[...])
    else:  # identity: stride == 1 and Cin == Cout
        y2 = y2 + x_ref[...].reshape(Nb * Ho, Lout).astype(jnp.float32)

    out_ref[...] = jnp.maximum(y2, 0.0).reshape(Nb, Ho, Lout).astype(out_ref.dtype)


# ---------------------------------------------------------------------------
# Wrapper: BasicBlock.forward
# ---------------------------------------------------------------------------
def basic_block_forward(x_nchw, params, stride=1, compute_dtype=jnp.bfloat16):
    """Equivalent of BasicBlock.forward.  x_nchw: (N, Cin, H, W) float32."""
    N, Cin, H, W = x_nchw.shape
    Cout = params["w1"].shape[-1]
    Ho = (H - 1) // stride + 1
    Wo = (W - 1) // stride + 1
    Lin = W * Cin
    L1 = Wo * Cout          # conv1 output lane width == output lane width

    # NCHW -> lane-packed (N, H, W*Cin); cast activations to the MXU dtype.
    x = jnp.transpose(x_nchw, (0, 2, 3, 1)).reshape(N, H, Lin).astype(compute_dtype)

    s1, b1 = _fold_bn(params["bn1"])
    s2, b2 = _fold_bn(params["bn2"])
    bw1 = _banded_conv3x3(params["w1"], s1, W, Wo, stride, compute_dtype)
    sh1 = _tile_shift(b1, Wo)
    bw2 = _banded_conv3x3(params["w2"], s2, Wo, Wo, 1, compute_dtype)
    sh2 = _tile_shift(b2, Wo)

    Nb = _pick_batch_block(N, Ho)

    in_specs = [
        pl.BlockSpec((Nb, H, Lin), lambda n: (n, 0, 0)),     # activations
        pl.BlockSpec(bw1.shape, lambda n: (0, 0)),           # conv1 banded w
        pl.BlockSpec(sh1.shape, lambda n: (0, 0)),           # bn1 shift
        pl.BlockSpec(bw2.shape, lambda n: (0, 0)),           # conv2 banded w
        pl.BlockSpec(sh2.shape, lambda n: (0, 0)),           # bn2 shift
    ]
    args = [x, bw1, sh1, bw2, sh2]

    if params["w_sc"] is not None:
        kind = "proj"
        ssc, bsc = _fold_bn(params["bn_sc"])
        wsc = params["w_sc"].reshape(Cin, Cout)
        bwsc = _banded_conv1x1(wsc, ssc, W, Wo, stride, compute_dtype)
        shsc = _tile_shift(bsc, Wo)
        in_specs += [pl.BlockSpec(bwsc.shape, lambda n: (0, 0)),
                     pl.BlockSpec(shsc.shape, lambda n: (0, 0))]
        args += [bwsc, shsc]
    else:
        kind = "identity"
        assert stride == 1 and Cin == Cout, "identity shortcut needs matching shapes"

    kernel = functools.partial(_basic_block_kernel, stride=stride, H=H, Ho=Ho,
                               shortcut=kind)

    out = pl.pallas_call(
        kernel,
        out_shape=jax.ShapeDtypeStruct((N, Ho, L1), jnp.float32),
        grid=(N // Nb,),
        in_specs=in_specs,
        out_specs=pl.BlockSpec((Nb, Ho, L1), lambda n: (n, 0, 0)),
        compiler_params=pltpu.CompilerParams(
            dimension_semantics=("parallel",),
            vmem_limit_bytes=32 * 1024 * 1024),
    )(*args)

    # lane-packed (N, Ho, Wo*Cout) -> NCHW
    return jnp.transpose(out.reshape(N, Ho, Wo, Cout), (0, 3, 1, 2))


# ---------------------------------------------------------------------------
# Pure-JAX reference (correctness check)
# ---------------------------------------------------------------------------
def _ref_forward(x_nchw, params, stride=1):
    x = jnp.transpose(x_nchw, (0, 2, 3, 1))

    def conv(inp, w, s, pad):
        return jax.lax.conv_general_dilated(
            inp, w, window_strides=(s, s), padding=pad,
            dimension_numbers=("NHWC", "HWIO", "NHWC"))

    def bn(inp, p):
        scale, shift = _fold_bn(p)
        return inp * scale + shift

    out = jax.nn.relu(bn(conv(x, params["w1"], stride, ((1, 1), (1, 1))),
                         params["bn1"]))
    out = bn(conv(out, params["w2"], 1, ((1, 1), (1, 1))), params["bn2"])
    if params["w_sc"] is not None:
        sc = bn(conv(x, params["w_sc"], stride, ((0, 0), (0, 0))),
                params["bn_sc"])
    else:
        sc = x
    out = jax.nn.relu(out + sc)
    return jnp.transpose(out, (0, 3, 1, 2))


# ---------------------------------------------------------------------------
# Main
# ---------------------------------------------------------------------------
if __name__ == "__main__":
    def bn_params(key, c):
        k0, k1, k2, k3 = jax.random.split(key, 4)
        return dict(
            gamma=1.0 + 0.1 * jax.random.normal(k0, (c,), jnp.float32),
            beta=0.1 * jax.random.normal(k1, (c,), jnp.float32),
            mean=0.05 * jax.random.normal(k2, (c,), jnp.float32),
            var=jnp.abs(1.0 + 0.1 * jax.random.normal(k3, (c,), jnp.float32)),
        )

    def make_params(key, cin, cout, stride):
        ks = jax.random.split(key, 6)
        p = dict(
            w1=0.1 * jax.random.normal(ks[0], (3, 3, cin, cout), jnp.float32),
            w2=0.1 * jax.random.normal(ks[1], (3, 3, cout, cout), jnp.float32),
            bn1=bn_params(ks[2], cout),
            bn2=bn_params(ks[3], cout),
        )
        if stride != 1 or cin != cout:
            p["w_sc"] = 0.1 * jax.random.normal(ks[4], (1, 1, cin, cout),
                                                jnp.float32)
            p["bn_sc"] = bn_params(ks[5], cout)
        else:
            p["w_sc"] = None
            p["bn_sc"] = None
        return p

    key = jax.random.PRNGKey(0)
    N, H, W = 2, 16, 16
    # (in_planes, planes, stride): projection shortcut (module's test config)
    # and identity shortcut.
    configs = [(4, 8, 1), (8, 8, 1)]

    for i, (cin, cout, stride) in enumerate(configs):
        kp, kx = jax.random.split(jax.random.fold_in(key, i))
        params = make_params(kp, cin, cout, stride)
        x = jax.random.normal(kx, (N, cin, H, W), jnp.float32)

        out = jax.block_until_ready(basic_block_forward(x, params, stride=stride))
        ref = jax.block_until_ready(_ref_forward(x, params, stride=stride))

        assert out.shape == (N, cout, H // stride, W // stride), out.shape
        max_err = float(jnp.max(jnp.abs(out - ref)))
        # bf16 MXU operands (f32 accumulation) -> relaxed tolerance.
        assert jnp.allclose(out, ref, atol=5e-2, rtol=5e-2), max_err

    print("KERNEL_OK")
</pallas_src>

<mosaic_0001>
module attributes {stable_mosaic.version = 11 : i64} {
  func.func @_basic_block_kernel(%arg0: i32, %arg1: memref<1x16x64xbf16, #tpu.memory_space<vmem>>, %arg2: memref<192x128xbf16, #tpu.memory_space<vmem>>, %arg3: memref<1x128xf32, #tpu.memory_space<vmem>>, %arg4: memref<384x128xbf16, #tpu.memory_space<vmem>>, %arg5: memref<1x128xf32, #tpu.memory_space<vmem>>, %arg6: memref<64x128xbf16, #tpu.memory_space<vmem>>, %arg7: memref<1x128xf32, #tpu.memory_space<vmem>>, %arg8: memref<1x16x128xf32, #tpu.memory_space<vmem>>) attributes {dimension_semantics = [#tpu.dimension_semantics<parallel>], iteration_bounds = array<i64: 2>, scalar_prefetch = 0 : i64, scratch_operands = 0 : i64, tpu.core_type = #tpu.core_type<tc>, window_params = [{transform_indices = @transform_0, window_bounds = array<i64: 1, 16, 64>}, {pipeline_mode = #tpu.pipeline_mode<synchronous>, transform_indices = @transform_1, window_bounds = array<i64: 192, 128>}, {pipeline_mode = #tpu.pipeline_mode<synchronous>, transform_indices = @transform_2, window_bounds = array<i64: 1, 128>}, {pipeline_mode = #tpu.pipeline_mode<synchronous>, transform_indices = @transform_3, window_bounds = array<i64: 384, 128>}, {pipeline_mode = #tpu.pipeline_mode<synchronous>, transform_indices = @transform_4, window_bounds = array<i64: 1, 128>}, {pipeline_mode = #tpu.pipeline_mode<synchronous>, transform_indices = @transform_5, window_bounds = array<i64: 64, 128>}, {pipeline_mode = #tpu.pipeline_mode<synchronous>, transform_indices = @transform_6, window_bounds = array<i64: 1, 128>}, {transform_indices = @transform_7, window_bounds = array<i64: 1, 16, 128>}]} {
    %c0 = arith.constant 0 : index
    %c0_0 = arith.constant 0 : index
    %c0_1 = arith.constant 0 : index
    %0 = vector.load %arg1[%c0, %c0_0, %c0_1] : memref<1x16x64xbf16, #tpu.memory_space<vmem>>, vector<1x15x64xbf16>
    %cst = arith.constant 0.000000e+00 : bf16
    %1 = vector.broadcast %cst : bf16 to vector<1x1x64xbf16>
    %2 = tpu.concatenate %1, %0 in 1 : vector<1x1x64xbf16>, vector<1x15x64xbf16> -> vector<1x16x64xbf16>
    %c0_2 = arith.constant 0 : index
    %c0_3 = arith.constant 0 : index
    %c0_4 = arith.constant 0 : index
    %3 = vector.load %arg1[%c0_2, %c0_3, %c0_4] : memref<1x16x64xbf16, #tpu.memory_space<vmem>>, vector<1x16x64xbf16>
    %c0_5 = arith.constant 0 : index
    %c1 = arith.constant 1 : index
    %c0_6 = arith.constant 0 : index
    %4 = vector.load %arg1[%c0_5, %c1, %c0_6] : memref<1x16x64xbf16, #tpu.memory_space<vmem>>, vector<1x15x64xbf16>
    %cst_7 = arith.constant 0.000000e+00 : bf16
    %5 = vector.broadcast %cst_7 : bf16 to vector<1x1x64xbf16>
    %6 = tpu.concatenate %4, %5 in 1 : vector<1x15x64xbf16>, vector<1x1x64xbf16> -> vector<1x16x64xbf16>
    %7 = tpu.concatenate %2, %3, %6 in 2 : vector<1x16x64xbf16>, vector<1x16x64xbf16>, vector<1x16x64xbf16> -> vector<1x16x192xbf16>
    %8 = vector.shape_cast %7 : vector<1x16x192xbf16> to vector<16x192xbf16>
    %c0_8 = arith.constant 0 : index
    %c0_9 = arith.constant 0 : index
    %9 = vector.load %arg2[%c0_8, %c0_9] : memref<192x128xbf16, #tpu.memory_space<vmem>>, vector<192x128xbf16>
    %cst_10 = arith.constant dense<0.000000e+00> : vector<16x128xf32>
    %10 = tpu.matmul %8, %9, %cst_10 {dimension_numbers = #tpu.dot_dimension_numbers<[1], [0], [0], [1], [0, 0, 1, 1], [], []>} : vector<16x192xbf16>, vector<192x128xbf16>, vector<16x128xf32> -> vector<16x128xf32>
    %c0_11 = arith.constant 0 : index
    %c0_12 = arith.constant 0 : index
    %11 = vector.load %arg3[%c0_11, %c0_12] : memref<1x128xf32, #tpu.memory_space<vmem>>, vector<1x128xf32>
    %12 = vector.broadcast %11 : vector<1x128xf32> to vector<16x128xf32>
    %13 = arith.addf %10, %12 : vector<16x128xf32>
    %cst_13 = arith.constant 0.000000e+00 : f32
    %14 = vector.broadcast %cst_13 : f32 to vector<16x128xf32>
    %15 = arith.maximumf %13, %14 : vector<16x128xf32>
    %16 = arith.truncf %15 : vector<16x128xf32> to vector<16x128xbf16>
    %17 = vector.shape_cast %16 : vector<16x128xbf16> to vector<1x16x128xbf16>
    %cst_14 = arith.constant 0.000000e+00 : bf16
    %18 = vector.broadcast %cst_14 : bf16 to vector<1x1x128xbf16>
    %19 = vector.extract_strided_slice %17 {offsets = [0, 0, 0], sizes = [1, 15, 128], strides = [1, 1, 1]} : vector<1x16x128xbf16> to vector<1x15x128xbf16>
    %20 = tpu.concatenate %18, %19 in 1 : vector<1x1x128xbf16>, vector<1x15x128xbf16> -> vector<1x16x128xbf16>
    %21 = vector.extract_strided_slice %17 {offsets = [0, 1, 0], sizes = [1, 15, 128], strides = [1, 1, 1]} : vector<1x16x128xbf16> to vector<1x15x128xbf16>
    %22 = tpu.concatenate %21, %18 in 1 : vector<1x15x128xbf16>, vector<1x1x128xbf16> -> vector<1x16x128xbf16>
    %23 = tpu.concatenate %20, %17, %22 in 2 : vector<1x16x128xbf16>, vector<1x16x128xbf16>, vector<1x16x128xbf16> -> vector<1x16x384xbf16>
    %24 = vector.shape_cast %23 : vector<1x16x384xbf16> to vector<16x384xbf16>
    %c0_15 = arith.constant 0 : index
    %c0_16 = arith.constant 0 : index
    %25 = vector.load %arg4[%c0_15, %c0_16] : memref<384x128xbf16, #tpu.memory_space<vmem>>, vector<384x128xbf16>
    %cst_17 = arith.constant dense<0.000000e+00> : vector<16x128xf32>
    %26 = tpu.matmul %24, %25, %cst_17 {dimension_numbers = #tpu.dot_dimension_numbers<[1], [0], [0], [1], [0, 0, 1, 1], [], []>} : vector<16x384xbf16>, vector<384x128xbf16>, vector<16x128xf32> -> vector<16x128xf32>
    %c0_18 = arith.constant 0 : index
    %c0_19 = arith.constant 0 : index
    %27 = vector.load %arg5[%c0_18, %c0_19] : memref<1x128xf32, #tpu.memory_space<vmem>>, vector<1x128xf32>
    %28 = vector.broadcast %27 : vector<1x128xf32> to vector<16x128xf32>
    %29 = arith.addf %26, %28 : vector<16x128xf32>
    %c0_20 = arith.constant 0 : index
    %c0_21 = arith.constant 0 : index
    %c0_22 = arith.constant 0 : index
    %30 = vector.load %arg1[%c0_20, %c0_21, %c0_22] : memref<1x16x64xbf16, #tpu.memory_space<vmem>>, vector<1x16x64xbf16>
    %31 = vector.shape_cast %30 : vector<1x16x64xbf16> to vector<16x64xbf16>
    %c0_23 = arith.constant 0 : index
    %c0_24 = arith.constant 0 : index
    %32 = vector.load %arg6[%c0_23, %c0_24] : memref<64x128xbf16, #tpu.memory_space<vmem>>, vector<64x128xbf16>
    %cst_25 = arith.constant dense<0.000000e+00> : vector<16x128xf32>
    %33 = tpu.matmul %31, %32, %cst_25 {dimension_numbers = #tpu.dot_dimension_numbers<[1], [0], [0], [1], [0, 0, 1, 1], [], []>} : vector<16x64xbf16>, vector<64x128xbf16>, vector<16x128xf32> -> vector<16x128xf32>
    %c0_26 = arith.constant 0 : index
    %c0_27 = arith.constant 0 : index
    %34 = vector.load %arg7[%c0_26, %c0_27] : memref<1x128xf32, #tpu.memory_space<vmem>>, vector<1x128xf32>
    %35 = vector.broadcast %34 : vector<1x128xf32> to vector<16x128xf32>
    %36 = arith.addf %33, %35 : vector<16x128xf32>
    %37 = arith.addf %29, %36 : vector<16x128xf32>
    %cst_28 = arith.constant 0.000000e+00 : f32
    %38 = vector.broadcast %cst_28 : f32 to vector<16x128xf32>
    %39 = arith.maximumf %37, %38 : vector<16x128xf32>
    %40 = vector.shape_cast %39 : vector<16x128xf32> to vector<1x16x128xf32>
    %c0_29 = arith.constant 0 : index
    %c0_30 = arith.constant 0 : index
    %c0_31 = arith.constant 0 : index
    %41 = vector.load %arg8[%c0_29, %c0_30, %c0_31] : memref<1x16x128xf32, #tpu.memory_space<vmem>>, vector<1x16x128xf32>
    tpu.vector_store %arg8[%c0_29, %c0_30, %c0_31], %40 {strides = array<i32>} : memref<1x16x128xf32, #tpu.memory_space<vmem>>, vector<1x16x128xf32>,
    return
  }
  func.func @transform_0(%arg0: i32) -> (i32, i32, i32) {
    %c0_i32 = arith.constant 0 : i32
    %c0_i32_0 = arith.constant 0 : i32
    %c0_i32_1 = arith.constant 0 : i32
    return %arg0, %c0_i32, %c0_i32_0 : i32, i32, i32
  }
  func.func @transform_1(%arg0: i32) -> (i32, i32) {
    %c0_i32 = arith.constant 0 : i32
    %c0_i32_0 = arith.constant 0 : i32
    %c0_i32_1 = arith.constant 0 : i32
    return %c0_i32, %c0_i32_0 : i32, i32
  }
  func.func @transform_2(%arg0: i32) -> (i32, i32) {
    %c0_i32 = arith.constant 0 : i32
    %c0_i32_0 = arith.constant 0 : i32
    %c0_i32_1 = arith.constant 0 : i32
    return %c0_i32, %c0_i32_0 : i32, i32
  }
  func.func @transform_3(%arg0: i32) -> (i32, i32) {
    %c0_i32 = arith.constant 0 : i32
    %c0_i32_0 = arith.constant 0 : i32
    %c0_i32_1 = arith.constant 0 : i32
    return %c0_i32, %c0_i32_0 : i32, i32
  }
  func.func @transform_4(%arg0: i32) -> (i32, i32) {
    %c0_i32 = arith.constant 0 : i32
    %c0_i32_0 = arith.constant 0 : i32
    %c0_i32_1 = arith.constant 0 : i32
    return %c0_i32, %c0_i32_0 : i32, i32
  }
  func.func @transform_5(%arg0: i32) -> (i32, i32) {
    %c0_i32 = arith.constant 0 : i32
    %c0_i32_0 = arith.constant 0 : i32
    %c0_i32_1 = arith.constant 0 : i32
    return %c0_i32, %c0_i32_0 : i32, i32
  }
  func.func @transform_6(%arg0: i32) -> (i32, i32) {
    %c0_i32 = arith.constant 0 : i32
    %c0_i32_0 = arith.constant 0 : i32
    %c0_i32_1 = arith.constant 0 : i32
    return %c0_i32, %c0_i32_0 : i32, i32
  }
  func.func @transform_7(%arg0: i32) -> (i32, i32, i32) {
    %c0_i32 = arith.constant 0 : i32
    %c0_i32_0 = arith.constant 0 : i32
    %c0_i32_1 = arith.constant 0 : i32
    return %arg0, %c0_i32, %c0_i32_0 : i32, i32, i32
  }
}

</mosaic_0001>

<bundles_post_ra>
// kernel: tpu_custom_call.1
= control target key start
LH: loop header
LB: loop body
LE: loop exit
PB: predicated region body
PF: predicated region fallthrough
CT: control target
= control target key end

     0   :  { %s1714_s0 = inlined_call_operand.hbm [shape: bf16[2,16,64], index: 0, kind: input, shape index: {}]   ;;  %s1715_s1 = inlined_call_operand.hbm [shape: bf16[192,128], index: 1, kind: input, shape index: {}]   ;;  %s1716_s2 = inlined_call_operand.vmem [shape: f32[1,128], index: 2, kind: input, shape index: {}]   ;;  %s1717_s3 = inlined_call_operand.hbm [shape: bf16[384,128], index: 3, kind: input, shape index: {}]   ;;  %s1718_s4 = inlined_call_operand.vmem [shape: f32[1,128], index: 4, kind: input, shape index: {}]   ;;  %s1719_s5 = inlined_call_operand.hbm [shape: bf16[64,128], index: 5, kind: input, shape index: {}]   ;;  %s1720_s6 = inlined_call_operand.vmem [shape: f32[1,128], index: 6, kind: input, shape index: {}]   ;;  %s1721_s7 = inlined_call_operand.hbm [shape: f32[2,16,128], index: 7, kind: output, shape index: {}]  }
   0x1   :  { %1724 = sst [smem:[#allocation15_spill]] %s1715_s1 }
   0x2   :  { %12 = vsyncpa [#allocation3], 0 }
   0x3   :  { %14 = vsyncpa [#allocation3 + $0x1], 0 }
   0x4   :  { %15 = vsyncpa [#allocation6], 0 }
   0x5   :  { %16 = vsyncpa [#allocation9], 0 }
   0x6   :  { %17 = vsyncpa [#allocation4], 0 }
   0x7   :  { %19 = vsyncpa [#allocation4 + $0x1], 0  ;;  %s1509_s24 = smov 0   ;;  %s1511_s25 = smov 0  }
   0x8   :  { %s1513_s26 = smov 0   ;;  %s1515_s27 = smov 0  }
   0x9 LB: > { %s1530_s28 = sadd.s32 4294967295, %s1459_s27   ;;  %s951_s29 = sadd.s32 4294967294, %s1459_s27   ;;  %s1459_s27 = sphi %s1515_s27, %s1742_s27   ;;  %s1455_s26 = sphi %s1513_s26, %s1741_s26   ;;  %s1451_s25 = sphi %s1511_s25, %s1740_s25   ;;  %s1447_s24 = sphi %s1509_s24, %s1739_s24  }
   0xa   : > { %p45_p0 = scmp.ne.s32.totalorder %s1451_s25, %s1447_s24  ;;  %p46_p1 = scmp.eq.s32.totalorder %s1530_s28, 0 }
   0xb   : > { %p195_p2 = scmp.eq.s32.totalorder %s1530_s28, 1  ;;  %p201_p3 = scmp.eq.s32.totalorder %s951_s29, 1 }
   0xc   : > { %p1539_p4 = por %p46_p1, %p45_p0  ;;  %p952_p5 = scmp.ge.s32.totalorder %s1459_s27, 1 }
   0xd   : > { %p1544_p6 = por %p201_p3, %p45_p0  ;;  %p208_p7 = scmp.lt.s32.totalorder %s1459_s27, 3 }
   0xe   : > { %s1727_s1 = sld [smem:[#allocation15_spill]]  ;;  %s1461_s13 = smov [#allocation5]  }
   0xf   : > { %p1552_p8 = pnand %p952_p5, %p208_p7  ;;  %s221_s14 = sshll.u32 %s1461_s13, 4  ;;  %s222_s14 = int_to_ptr.vmem [resolvable:$true] %s221_s14 }
  0x10   : > { %s236_s18 = sshll.u32 %s1717_s3, 4  ;;  %s1722_s19 = smov 64   ;;  %s237_s18 = int_to_ptr.hbm [resolvable:$true] %s236_s18 }
  0x11   : > { %p1196_p9 = pneg %p1552_p8  ;;  %s1723_s20 = smov 4  }
  0x12   : > { %s1464_s21 = smov [#allocation7]   ;;  %s253_s9 = sshll.u32 %s1719_s5, 4  ;;  %s254_s9 = int_to_ptr.hbm [resolvable:$true] %s253_s9 }
  0x13   : > { %p1560_p10 = pnand %p1196_p9, %p46_p1  ;;  %s238_s22 = sshll.u32 %s1464_s21, 4  ;;  %s239_s22 = int_to_ptr.vmem [resolvable:$true] %s238_s22 }
  0x14   : > { %s219_s11 = sshll.u32 %s1727_s1, 4  ;;  %s1465_s10 = smov [#allocation8]   ;;  %s220_s11 = int_to_ptr.hbm [resolvable:$true] %s219_s11 }
  0x15   : > { %1199 = dma.hbm_to_vmem [thread:$0]  (!%p1560_p10), %s220_s11, 1536, %s222_s14, [#allocation6], %s1722_s19, %s1722_s19, %s1723_s20  }
  0x16   : > { %1202 = dma.hbm_to_vmem [thread:$0]  (!%p1560_p10), %s237_s18, 3072, %s239_s22, [#allocation6], %s1722_s19, %s1722_s19, %s1723_s20  }
  0x17   : > { %s255_s11 = sshll.u32 %s1465_s10, 4  ;;  %s1582_s13 = sadd.s32 1, %s1459_s27   ;;  %s256_s11 = int_to_ptr.vmem [resolvable:$true] %s255_s11 }
  0x18   : > { %1205 = dma.hbm_to_vmem [thread:$0]  (!%p1560_p10), %s254_s9, 512, %s256_s11, [#allocation9], %s1722_s19, %s1722_s19, %s1723_s20  }
  0x19   : > { %s29_s14 = ssub.s32 %s1459_s27, %s1582_s13  ;;  %s32_s16 = sadd.s32 1, %s1455_s26 }
  0x1a   : > { %p30_p12 = scmp.eq.s32.totalorder %s29_s14, 0  ;;  %p39_p13 = scmp.ne.s32.totalorder %s1455_s26, %s1451_s25 }
  0x1b   : > { %p40_p0 = scmp.eq.s32.totalorder %s1459_s27, 0  ;;  %p1217_p5 = scmp.lt.s32.totalorder %s1459_s27, 2 }
  0x1c   : > { %s1596_s17 = scalar_select %p30_p12, %s1455_s26, %s32_s16  }
  0x1d   : > { %p1600_p3 = por %p195_p2, %p39_p13  ;;  %s272_s21 = sand.u32 1, %s1455_s26  }
  0x1e   : > { %s1137_s15 = sshll.u32 %s1459_s27, 3  ;;  %p41_p7 = por %p40_p0, %p39_p13 }
  0x1f   : > { %s957_s22 = sshll.u32 %s272_s21, 3  ;;  %s281_s9 = scalar_lea.hbm %s1714_s0, %s1137_s15 }
  0x20   : > { %s282_s10 = sshll.u32 %s281_s9, 4  ;;  %s276_s11 = scalar_lea.vmem [#allocation2], %s957_s22  ;;  %s283_s10 = int_to_ptr.hbm [resolvable:$true] %s282_s10 }
  0x21   : > { %s284_s14 = sshll.u32 %s276_s11, 4  ;;  %p1610_p9 = pnand %p1217_p5, %p41_p7  ;;  %s285_s14 = int_to_ptr.vmem [resolvable:$true] %s284_s14 }
  0x22   : > { %s273_s19 = scalar_lea.sflag [#allocation3], %s272_s21  ;;  %s1355_s20 = sshra.s32 %s283_s10, 4  ;;  %s1356_s20 = int_to_ptr.hbm [resolvable:$true] %s1355_s20 }
  0x23   : > { %s1357_s1 = scalar_lea.hbm %s1356_s20, 8  ;;  %p1359_p10 = pneg %p1610_p9 }
  0x24   : > { %p1358_p2 = scmp.ne.s32.totalorder %s1356_s20, %s1357_s1  ;;  %s1362_s22 = scalar_lea.hbm %s1714_s0, 16 }
  0x25   : > { %p1363_p0 = scmp.lt.s32.totalorder %s1356_s20, %s1714_s0  ;;  %p1364_p5 = scmp.lt.s32.totalorder %s1362_s22, %s1357_s1 }
  0x26   : > { %p1360_p12 = pnand %p1359_p10, %p1358_p2 }
  0x27   : > { %p1365_p7 = por %p1364_p5, %p1363_p0 }
  0x28   : > { %p1361_p13 = pneg %p1360_p12 }
  0x2a   : > { %p1366_p11 = pnand %p1365_p7, %p1361_p13 }
  0x2c   : > { %1369 = shalt.err (!%p1366_p11)
}
  0x2d   : > { %s1732_s21 = smov 4   ;;  %s1733_s11 = smov 64  }
  0x2e   : > { %1209 = dma.hbm_to_vmem [thread:$0]  (!%p1610_p9), %s283_s10, 128, %s285_s14, %s273_s19, %s1733_s11, %s1733_s11, %s1732_s21  }
  0x2f   : > { %296 = sbr.rel (%p1552_p8) target bundleno = 481 (0x1e1), region = 48  ;;  %s1630_s15 = sand.u32 (!%p1552_p8), 1, %s1451_s25  }
  0x30   : > { %s961_s20 = sshll.u32 (!%p1552_p8), %s1630_s15, 3  ;;  %s299_s1 = scalar_lea.sflag (!%p1552_p8), [#allocation3], %s1630_s15 }
  0x31   : > { %s302_s23 = scalar_lea.vmem (!%p1552_p8), [#allocation2], %s961_s20 }
  0x34   : > { %1430 = dma.done.wait (%p1539_p4), %s299_s1, 128  }
  0x35   : > { %1432 = vsyncadd (%p1539_p4), %s299_s1, 4294967168 }
  0x36   : > { %1434 = dma.done.wait (%p46_p1), [#allocation6], 4608  }
  0x37   : > { %1436 = vsyncadd (%p46_p1), [#allocation6], 4294962688 }
  0x38   : > { %1438 = dma.done.wait (%p46_p1), [#allocation9], 512  }
  0x39   : > { %1440 = vsyncadd (%p46_p1), [#allocation9], 4294966784  ;;  %v1646_v0 = vld [vmem:[%s302_s23] sm:$0xff]  ;;  %s1466_s12 = smov 64   ;;  %v1144_v6 = vld [vmem:[#allocation5 + $0x28] sm:$0xff]  ;;  %vm372_vm0 = vcmask 1047552  }
  0x3a   : > { %v1146_v1 = vld [vmem:[#allocation5 + $0x38] sm:$0xff]  ;;  %376 = vrot.lane.b32.xlu0 %v1646_v0, %s1466_s12  ;;  %v1145_v3 = vld [vmem:[#allocation5 + $0x30] sm:$0xff]  ;;  %v361_v5 = vshll.u32 %v1646_v0, 16  ;;  %v1148_v7 = vld [vmem:[#allocation5 + $0x48] sm:$0xff]  ;;  %v358_v8 = vshrl.u32 %v1646_v0, 16  ;;  %vm378_vm3 = vcmask 523264  }
  0x3b   : > { %v1150_v2 = vld [vmem:[#allocation5 + $0x58] sm:$0xff]  ;;  %486 = vmatpush.bf16.msra.mxu0 %v1146_v1  ;;  %v1149_v4 = vld [vmem:[#allocation5 + $0x50] sm:$0xff]  ;;  %vm373_vm1 = vsmask.f32 7424  ;;  %v1143_v10 = vld [vmem:[#allocation5 + $0x20] sm:$0xff]  ;;  %vm365_vm4 = vcmask 1040384  }
  0x3c   : > { %504 = vmatpush.bf16.msra.mxu1 %v1150_v2  ;;  %v369_v9 = vrot.slane %v361_v5, 1  ;;  %v1147_v11 = vld [vmem:[#allocation5 + $0x40] sm:$0xff]  ;;  %vm1651_vm2 = vmand %vm372_vm0, %vm373_vm1  ;;  %v1142_v14 = vld [vmem:[#allocation5 + $0x18] sm:$0xff]  ;;  %v360_v20 = vrot.slane %v358_v8, 7  ;;  %vm366_vm5 = vsmask.f32 256 }
  0x3d   : > { %v1141_v16 = vld [vmem:[#allocation5 + $0x10] sm:$0xff]  ;;  %v1140_v17 = vld [vmem:[#allocation5 + $0x8] sm:$0xff]  ;;  %v1139_v18 = vld [vmem:[#allocation5] sm:$0xff]  ;;  %s965_s29 = sshll.u32 %s1630_s15, 4  ;;  %s1179_s9 = sshll.u32 %s1530_s28, 4 }
  0x3e   : > { %v370_v12 = vor.u32 %v369_v9, %v358_v8  ;;  %v1166_v19 = vld [vmem:[#allocation7 + $0x78] sm:$0xff]  ;;  %v363_v21 = vor.u32 %v361_v5, %v360_v20  ;;  %vm1658_vm6 = vmand %vm365_vm4, %vm366_vm5  ;;  %v1165_v23 = vld [vmem:[#allocation7 + $0x70] sm:$0xff]  ;;  %s845_s20 = scalar_lea.hbm %s1721_s7, %s1179_s9  ;;  %s348_s1 = scalar_lea.vmem [#allocation10], %s965_s29 }
  0x3f   : > { %487 = vmatpush.bf16.msra.mxu0 %v1145_v3  ;;  %747 = vmatpush.bf16.msra.mxu3 %v1166_v19  ;;  %v1158_v24 = vld [vmem:[#allocation7 + $0x38] sm:$0xff]  ;;  %v1164_v26 = vld [vmem:[#allocation7 + $0x68] sm:$0xff]  ;;  %v1157_v30 = vld [vmem:[#allocation7 + $0x30] sm:$0xff]  ;;  %s846_s23 = sshll.u32 %s348_s1, 4  ;;  %s848_s12 = sshll.u32 %s845_s20, 4  ;;  %s847_s23 = int_to_ptr.vmem [resolvable:$true] %s846_s23  ;;  %s849_s12 = int_to_ptr.hbm [resolvable:$true] %s848_s12 }
  0x40   : > { %505 = vmatpush.bf16.msra.mxu1 %v1149_v4  ;;  %v375_v15 = vsel %vm1651_vm2, %v370_v12, 0  ;;  %v1174_v25 = vld [vmem:[#allocation7 + $0xb8] sm:$0xff]  ;;  %733 = vmatpush.bf16.msra.mxu2 %v1158_v24  ;;  %v368_v27 = vsel %vm1658_vm6, 0, %v363_v21  ;;  %v1173_v31 = vld [vmem:[#allocation7 + $0xb0] sm:$0xff]  ;;  %v1163_v32 = vld [vmem:[#allocation7 + $0x60] sm:$0xff]  ;;  %s834_s28 = scalar_lea.sflag [#allocation4], %s1630_s15 }
  0x41   : > { %v1156_v33 = vld [vmem:[#allocation7 + $0x28] sm:$0xff]  ;;  %v1162_v35 = vld [vmem:[#allocation7 + $0x58] sm:$0xff]  ;;  %v1155_v36 = vld [vmem:[#allocation7 + $0x20] sm:$0xff]  ;;  %s1399_s30 = sshra.s32 %s849_s12, 4  ;;  %s1405_s16 = scalar_lea.hbm %s1721_s7, 32  ;;  %s1400_s30 = int_to_ptr.hbm [resolvable:$true] %s1399_s30 }
  0x42   : > { %v1172_v34 = vld [vmem:[#allocation7 + $0xa8] sm:$0xff]  ;;  %v1171_v37 = vld [vmem:[#allocation7 + $0xa0] sm:$0xff]  ;;  %v1161_v38 = vld [vmem:[#allocation7 + $0x50] sm:$0xff]  ;;  %s1401_s19 = scalar_lea.hbm %s1400_s30, 16  ;;  %p1406_p11 = scmp.lt.s32.totalorder %s1400_s30, %s1721_s7 }
  0x43   : > { %488 = vmatpush.bf16.msra.mxu0 %v1144_v6  ;;  %748 = vmatpush.bf16.msra.mxu3 %v1165_v23  ;;  %v1154_v39 = vld [vmem:[#allocation7 + $0x18] sm:$0xff]  ;;  %v1160_v41 = vld [vmem:[#allocation7 + $0x48] sm:$0xff]  ;;  %v1153_v43 = vld [vmem:[#allocation7 + $0x10] sm:$0xff]  ;;  %p1402_p1 = scmp.ne.s32.totalorder %s1400_s30, %s1401_s19  ;;  %p1407_p9 = scmp.lt.s32.totalorder %s1405_s16, %s1401_s19 }
  0x44   : > { %506 = vmatpush.bf16.msra.mxu1 %v1148_v7  ;;  %734 = vmatpush.bf16.msra.mxu2 %v1157_v30  ;;  %v1170_v40 = vld [vmem:[#allocation7 + $0x98] sm:$0xff]  ;;  %v1169_v44 = vld [vmem:[#allocation7 + $0x90] sm:$0xff]  ;;  %v1159_v45 = vld [vmem:[#allocation7 + $0x40] sm:$0xff] }
  0x45   : > { %v1178_v42 = vld [vmem:[#allocation8 + $0x18] sm:$0xff]  ;;  %v1177_v46 = vld [vmem:[#allocation8 + $0x10] sm:$0xff]  ;;  %v1152_v47 = vld [vmem:[#allocation7 + $0x8] sm:$0xff]  ;;  %p1403_p4 = pnand %p1402_p1, %p1600_p3  ;;  %p1408_p2 = por %p1407_p9, %p1406_p11 }
  0x46   : > { %v1168_v48 = vld [vmem:[#allocation7 + $0x88] sm:$0xff]  ;;  %v1151_v50 = vld [vmem:[#allocation7] sm:$0xff]  ;;  %v1262_v53 = vld [vmem:[%s1716_s2] ss:$0 sm:$0xff] }
  0x47   : > { %489 = vmatpush.bf16.msra.mxu0 %v1143_v10  ;;  %749 = vmatpush.bf16.msra.mxu3 %v1164_v26  ;;  %v1176_v49 = vld [vmem:[#allocation8 + $0x8] sm:$0xff]  ;;  %v1167_v51 = vld [vmem:[#allocation7 + $0x80] sm:$0xff]  ;;  %p1404_p8 = pneg %p1403_p4 }
  0x48   : > { %507 = vmatpush.bf16.msra.mxu1 %v1147_v11  ;;  %735 = vmatpush.bf16.msra.mxu2 %v1156_v33  ;;  %v1175_v52 = vld [vmem:[#allocation8] sm:$0xff] }
  0x49   : > { %p1409_p10 = pnand %p1408_p2, %p1404_p8 }
  0x4b   : > { %490 = vmatpush.bf16.msra.mxu0 %v1142_v14  ;;  %1018 = vmatmul.msk.bf16.vlgmr.msra.gmra.mxu1 %vm378_vm3, %v375_v15  ;;  %v1264_v14 = vld [vmem:[%s1718_s4] ss:$0 sm:$0xff] }
  0x4c   : > { %761 = vmatpush.bf16.msrb.mxu1 %v1174_v25  ;;  %750 = vmatpush.bf16.msra.mxu3 %v1163_v32  ;;  %v1263_v15 = vld [vmem:[%s1720_s6] ss:$0 sm:$0xff] }
  0x4d   : > { %736 = vmatpush.bf16.msra.mxu2 %v1155_v36 }
  0x4f   : > { %491 = vmatpush.bf16.msra.mxu0 %v1141_v16 }
  0x50   : > { %762 = vmatpush.bf16.msrb.mxu1 %v1173_v31  ;;  %751 = vmatpush.bf16.msra.mxu3 %v1162_v35 }
  0x51   : > { %737 = vmatpush.bf16.msra.mxu2 %v1154_v39 }
  0x53   : > { %492 = vmatpush.bf16.msra.mxu0 %v1140_v17 }
  0x54   : > { %763 = vmatpush.bf16.msrb.mxu1 %v1172_v34  ;;  %752 = vmatpush.bf16.msra.mxu3 %v1161_v38 }
  0x55   : > { %738 = vmatpush.bf16.msra.mxu2 %v1153_v43 }
  0x57   : > { %493 = vmatpush.bf16.msra.mxu0 %v1139_v18 }
  0x58   : > { %764 = vmatpush.bf16.msrb.mxu1 %v1171_v37  ;;  %753 = vmatpush.bf16.msra.mxu3 %v1160_v41 }
  0x59   : > { %739 = vmatpush.bf16.msra.mxu2 %v1152_v47 }
  0x5b   : > { %817 = vmatpush.bf16.msrb.mxu0 %v1178_v42 }
  0x5c   : > { %765 = vmatpush.bf16.msrb.mxu1 %v1170_v40  ;;  %754 = vmatpush.bf16.msra.mxu3 %v1159_v45 }
  0x5d   : > { %740 = vmatpush.bf16.msra.mxu2 %v1151_v50 }
  0x5f   : > { %818 = vmatpush.bf16.msrb.mxu0 %v1177_v46 }
  0x60   : > { %766 = vmatpush.bf16.msrb.mxu1 %v1169_v44 }
  0x63   : > { %819 = vmatpush.bf16.msrb.mxu0 %v1176_v49 }
  0x64   : > { %767 = vmatpush.bf16.msrb.mxu1 %v1168_v48 }
  0x67   : > { %820 = vmatpush.bf16.msrb.mxu0 %v1175_v52 }
  0x68   : > { %768 = vmatpush.bf16.msrb.mxu1 %v1167_v51 }
  0xac   : > { %v377_v28 = vpop.permute.xlu0 %376 }
  0xad   : > { %v381_v29 = vsel %vm378_vm3, %v368_v27, %v377_v28 }
  0xae   : > { %494 = vmatmul.bf16.vlgmr.msra.gmra.mxu0 %v381_v29 }
  0xbe   : > { %1131 = vmatmul.msk.bf16.vlgmr.msrb.gmra.mxu0 %vm378_vm3, %v1646_v0 }
  0xc8   : > { %v509_v54 = vpop.f32.mrf.mxu1 }
  0xd0   : > { %v511_v61 = vpop.f32.mrf.mxu1 }
 0x12b   : > { %v495_v55 = vpop.f32.mrf.mxu0 }
 0x12c   : > { %v496_v56 = vadd.f32 %v1262_v53, %v495_v55 }
 0x12e   : > { %v510_v57 = vadd.f32 %v509_v54, %v496_v56 }
 0x130   : > { %v514_v59 = vmax.f32 %v510_v57, 0.0 }
 0x132   : > { %v516_v63 = vpack.c.bf16 %v514_v59, %v514_v59 }
 0x133   : > { %v497_v58 = vpop.f32.mrf.mxu0 }
 0x134   : > { %v498_v60 = vadd.f32 %v1262_v53, %v497_v58  ;;  %v520_v3 = vunpack.c.l.b16 %v516_v63 }
 0x136   : > { %v512_v62 = vadd.f32 %v511_v61, %v498_v60 }
 0x138   : > { %v515_v1 = vmax.f32 %v512_v62, 0.0 }
 0x13a   : > { %v517_v2 = vpack.c.bf16 %v515_v1, %v515_v1 }
 0x13b   : > { %v822_v16 = vpop.f32.mrf.mxu0 }
 0x13c   : > { %v521_v4 = vunpack.c.l.b16 %v517_v2  ;;  %v823_v21 = vadd.f32 %v1263_v15, %v822_v16 }
 0x13e   : > { %v522_v5 = vpack.c.b16 %v521_v4, %v520_v3 }
 0x140   : > { %755 = vmatmul.bf16.vlgmr.msra.gmra.mxu3 %v522_v5  ;;  %v524_v6 = vshrl.u32 %v522_v5, 16  ;;  %v527_v7 = vshll.u32 %v522_v5, 16 }
 0x142   : > { %v526_v8 = vrot.slane %v524_v6, 7  ;;  %v532_v0 = vrot.slane %v527_v7, 1 }
 0x143   : > { %v824_v28 = vpop.f32.mrf.mxu0 }
 0x144   : > { %v529_v9 = vor.u32 %v527_v7, %v526_v8  ;;  %v533_v10 = vor.u32 %v532_v0, %v524_v6  ;;  %v825_v31 = vadd.f32 %v1263_v15, %v824_v28 }
 0x146   : > { %v531_v11 = vsel %vm1658_vm6, 0, %v529_v9  ;;  %v535_v12 = vsel %vm1651_vm2, %v533_v10, 0 }
 0x147   : > { %741 = vmatmul.bf16.vlgmr.msra.gmra.mxu2 %v531_v11  ;;  %769 = vmatmul.bf16.vlgmr.msrb.gmra.mxu1 %v535_v12 }
 0x1c3   : > { %v756_v17 = vpop.f32.mrf.mxu3 }
 0x1c4   : > { %v770_v20 = vpop.f32.mrf.mxu1 }
 0x1ca   : > { %v742_v18 = vpop.f32.mrf.mxu2 }
 0x1cb   : > { %v743_v19 = vadd.f32 %v1264_v14, %v742_v18  ;;  %v758_v27 = vpop.f32.mrf.mxu3 }
 0x1cc   : > { %v772_v30 = vpop.f32.mrf.mxu1 }
 0x1cd   : > { %v757_v22 = vadd.f32 %v756_v17, %v743_v19 }
 0x1cf   : > { %v771_v13 = vadd.f32 %v770_v20, %v757_v22 }
 0x1d1   : > { %v827_v23 = vadd.f32 %v823_v21, %v771_v13 }
 0x1d2   : > { %v744_v24 = vpop.f32.mrf.mxu2 }
 0x1d3   : > { %v829_v25 = vmax.f32 %v827_v23, 0.0  ;;  %v745_v26 = vadd.f32 %v1264_v14, %v744_v24 }
 0x1d5   : > { %831 = vst [vmem:[%s348_s1] sm:$0xff] %v829_v25  ;;  %v759_v29 = vadd.f32 %v758_v27, %v745_v26 }
 0x1d7   : > { %v773_v32 = vadd.f32 %v772_v30, %v759_v29 }
 0x1d9   : > { %v828_v33 = vadd.f32 %v825_v31, %v773_v32 }
 0x1db   : > { %v830_v34 = vmax.f32 %v828_v33, 0.0 }
 0x1dd   : > { %832 = vst [vmem:[%s348_s1 + $0x8] sm:$0xff] %v830_v34 }
 0x1de   : > { %1412 = shalt.err (!%p1409_p10)
}
 0x1df   : > { %s1467_s15 = smov 128   ;;  %s1468_s9 = smov 8  }
 0x1e0   : > { %1194 = dma.vmem_to_hbm [thread:$0]  (%p1600_p3), %s847_s23, 256, %s849_s12, %s834_s28, %s1467_s15, %s1467_s15, %s1468_s9  }
 0x1e1 PF: > { %s863_s21 = sand.u32 1, %s1447_s24   ;;  %p1738_p12 = scmp.ge.s32.totalorder %s1459_s27, 2 }
 0x1e2   : > { %s864_s11 = scalar_lea.sflag [#allocation4], %s863_s21 }
 0x1e3   : > { %p1211_p13 = pnand %p1738_p12, %p1544_p6 }
 0x1e5   : > { %p1212_p0 = pneg %p1211_p13 }
 0x1e7   : > { %1442 = dma.done.wait (%p1212_p0), %s864_s11, 256  }
 0x1e8   : > { %1444 = vsyncadd (%p1212_p0), %s864_s11, 4294967040  ;;  %p22_p5 = scmp.ge.s32.totalorder %s1582_s13, 4   ;;  %s1739_s24 = smov %s1451_s25 }
 0x1e9   : > { %s1740_s25 = smov %s1455_s26  ;;  %s1741_s26 = smov %s1596_s17 }
 0x1ea   : > { %s1742_s27 = smov %s1582_s13  ;;  %24 = sbr.rel (!%p22_p5) target bundleno = 9 (0x9), region = 105 }
 0x1ef   :  { %870 = vsyncpa [#allocation3], 1 }
 0x1f0   :  { %872 = vsyncpa [#allocation3 + $0x1], 1 }
 0x1f1   :  { %873 = vsyncpa [#allocation6], 1 }
 0x1f2   :  { %874 = vsyncpa [#allocation9], 1 }
 0x1f3   :  { %875 = vsyncpa [#allocation4], 1 }
 0x1f4   :  { %877 = vsyncpa [#allocation4 + $0x1], 1 }

</bundles_post_ra>
